<compile_context>
chip_gen: v7x
topology: tpu7x:2x2x1
jax: 0.10.0
libtpu: 0.0.40
codegen_flags: <defaults>
</compile_context>

<pallas_src>
import math
from functools import partial

import numpy as np
import jax
import jax.numpy as jnp
from jax.experimental import pallas as pl
from jax.experimental.pallas import tpu as pltpu

NUM_HEADS = 4


def _round_up(x, m):
    return (x + m - 1) // m * m


# ------------------------------------ kernel ----------------------------------------
def _graph_trans_kernel(x_ref, adj_ref, w0_ref, b0_ref, ln_g_ref, ln_b_ref,
                        wb_ref, bb_ref, wo_ref, bo_ref, o_ref,
                        qkvs_ref, act_ref, *, heads, row_tile, md, approx_recip):
    """Grid = (conv_stage, query_row_tile).

    Stage 0 is the input TransformerConv; stages 1..L are LayerNorm + conv + ReLU.
    The final Linear is fused as a per-row-tile epilogue: it is recomputed every
    stage (cheap) and only the last stage's writeback of each output block survives.
    """
    s = pl.program_id(0)                       # conv stage
    r = pl.program_id(1)                       # query-row tile
    hid = act_ref.shape[1]
    d = hid // heads

    # ---- once per stage (first row tile): fused QKVS projection into VMEM scratch --
    # Wq|Wk|Wv|Ws fused to one [Fin, 4H] weight -> one lane-dense MXU matmul.
    # 1/sqrt(d_head) is already folded into Wq / bq by the wrapper.
    @pl.when(r == 0)
    def _project():
        @pl.when(s == 0)
        def _():                                                    # input conv
            q = jnp.dot(x_ref[...].astype(md), w0_ref[...],
                        preferred_element_type=jnp.float32) + b0_ref[...]
            qkvs_ref[...] = q.astype(md)

        @pl.when(s >= 1)
        def _():                                                    # LayerNorm + conv
            h = act_ref[...]
            mu = jnp.mean(h, axis=-1, keepdims=True)
            hc = h - mu
            var = jnp.mean(hc * hc, axis=-1, keepdims=True)
            hn = (hc * jax.lax.rsqrt(var + jnp.float32(1e-5))
                  * ln_g_ref[0] + ln_b_ref[0])
            q = jnp.dot(hn.astype(md), wb_ref[0],
                        preferred_element_type=jnp.float32) + bb_ref[0]
            qkvs_ref[...] = q.astype(md)

    # ---- every (stage, row tile): masked attention over all keys -------------------
    row0 = pl.multiple_of(r * row_tile, row_tile)
    adj = adj_ref[...]                                    # [T, N] 0/1 mask (bf16)
    edge = adj > 0
    has_in = jnp.max(adj, axis=-1, keepdims=True) > 0     # [T, 1] row has an in-edge

    qs = qkvs_ref[pl.ds(row0, row_tile), :]               # [T, 4H] this tile's q|skip
    outs = []
    for hh in range(heads):                               # heads is tiny & static
        lo = hh * d
        q_h = qs[:, lo:lo + d]                                        # [T, d]
        k_h = qkvs_ref[:, hid + lo:hid + lo + d]                      # [N, d]
        v_h = qkvs_ref[:, 2 * hid + lo:2 * hid + lo + d]              # [N, d]
        # scores: contract last dim of BOTH operands (no explicit k.T relayout)
        sc = jax.lax.dot_general(q_h, k_h, (((1,), (1,)), ((), ())),
                                 preferred_element_type=jnp.float32)  # [T, N]
        sc = jnp.where(edge, sc, jnp.float32(-1e30))
        m = jnp.max(sc, axis=-1, keepdims=True)
        e = jnp.exp(sc - m)                               # non-edges underflow to 0
        den = jnp.sum(e, axis=-1, keepdims=True)          # >= 1 when row has an edge
        # deferred normalization: aggregate, then one [T,1] reciprocal broadcast
        un = jax.lax.dot_general(e.astype(md), v_h, (((1,), (0,)), ((), ())),
                                 preferred_element_type=jnp.float32)  # [T, d]
        outs.append(un * pl.reciprocal(den, approx=approx_recip))
    agg = jnp.concatenate(outs, axis=-1)                  # ONE lane-dense [T, hid]

    skip = qs[:, 3 * hid:].astype(jnp.float32)            # root transform x Ws + bs
    out = jnp.where(has_in, agg, jnp.float32(0.0)) + skip
    out = jnp.where(s >= 1, jnp.maximum(out, 0.0), out)   # ReLU only after block convs
    act_ref[pl.ds(row0, row_tile), :] = out               # carried to the next stage

    # fused output head (F.dropout is identity in eval mode); only the final stage's
    # writeback of this output block survives in HBM.
    o_ref[...] = (jnp.dot(out.astype(md), wo_ref[...],
                          preferred_element_type=jnp.float32) + bo_ref[...])


# ------------------------------------ wrapper ---------------------------------------
def graph_trans_forward(x, adj, params, *, heads, matmul_dtype=jnp.bfloat16,
                        row_tile=None):
    """Full GraphTrans forward in one pallas_call.

    matmul_dtype: MXU operand dtype — bf16 by default (helps v5e/v6e/v7x alike);
    accumulation, softmax and LayerNorm statistics always stay in f32.
    """
    md = matmul_dtype
    n, in_dim = x.shape
    hidden = params["conv0"]["wq"].shape[1]
    assert hidden % heads == 0
    d_head = hidden // heads

    def fuse(p):   # Wq|Wk|Wv|Ws -> one [Fin, 4H] weight; fold 1/sqrt(d) into Wq / bq
        scale = jnp.float32(1.0 / math.sqrt(d_head))
        w = jnp.concatenate([p["wq"] * scale, p["wk"], p["wv"], p["ws"]],
                            axis=1).astype(md)
        b = jnp.concatenate([p["bq"] * scale, p["bk"], p["bv"], p["bs"]],
                            axis=1).astype(jnp.float32)
        return w, b

    w0, b0 = fuse(params["conv0"])
    blocks = params["blocks"]
    num_blocks = len(blocks)
    if num_blocks:
        ln_g = jnp.stack([ln["gamma"] for ln, _ in blocks]).astype(jnp.float32)
        ln_b = jnp.stack([ln["beta"] for ln, _ in blocks]).astype(jnp.float32)
        wb, bb = zip(*[fuse(conv) for _, conv in blocks])
        wb = jnp.stack(wb)                                   # [L, H, 4H]
        bb = jnp.stack(bb)                                   # [L, 1, 4H]
    else:   # dummy single layer so shapes stay non-empty; never selected at runtime
        ln_g = jnp.ones((1, 1, hidden), jnp.float32)
        ln_b = jnp.zeros((1, 1, hidden), jnp.float32)
        wb = jnp.zeros((1, hidden, 4 * hidden), md)
        bb = jnp.zeros((1, 1, 4 * hidden), jnp.float32)
    nb = max(num_blocks, 1)

    out_dim = params["out"]["w"].shape[1]
    out_p = _round_up(out_dim, 128)        # lane-dense output slab; sliced afterwards
    wo = jnp.zeros((hidden, out_p), md).at[:, :out_dim].set(
        params["out"]["w"].astype(md))
    bo = jnp.zeros((1, out_p), jnp.float32).at[:, :out_dim].set(
        params["out"]["b"].astype(jnp.float32))

    # row tiling: pad node count so every tile is full; phantom rows have no edges and
    # are sliced away afterwards.
    if row_tile is None:
        row_tile = 256 if n > 256 else _round_up(n, 8)
    row_tile = _round_up(row_tile, 8)
    npad = _round_up(n, row_tile)
    x_p = jnp.zeros((npad, in_dim), jnp.float32).at[:n].set(x.astype(jnp.float32))
    adj_p = jnp.zeros((npad, npad), jnp.bfloat16).at[:n, :n].set(
        adj.astype(jnp.bfloat16))               # 0/1 mask is exact in bf16

    n_stages = 1 + num_blocks
    grid = (n_stages, npad // row_tile)

    full = lambda shp: pl.BlockSpec(shp, lambda s, r: (0,) * len(shp))
    layer_ix = lambda s, r: (jnp.minimum(jnp.maximum(s - 1, 0), nb - 1), 0, 0)

    in_specs = [
        full((npad, in_dim)),                                    # x     (DMA'd once)
        pl.BlockSpec((row_tile, npad), lambda s, r: (r, 0)),     # adj   (streamed)
        full((in_dim, 4 * hidden)),                              # w0
        full((1, 4 * hidden)),                                   # b0
        pl.BlockSpec((1, 1, hidden), layer_ix),                  # LN gamma (per stage)
        pl.BlockSpec((1, 1, hidden), layer_ix),                  # LN beta
        pl.BlockSpec((1, hidden, 4 * hidden), layer_ix),         # block conv weights
        pl.BlockSpec((1, 1, 4 * hidden), layer_ix),              # block conv biases
        full((hidden, out_p)),                                   # wo
        full((1, out_p)),                                        # bo
    ]
    out_specs = pl.BlockSpec((row_tile, out_p), lambda s, r: (r, 0))

    # rough resident-footprint estimate -> explicit scoped-VMEM limit with headroom.
    isz = jnp.dtype(md).itemsize
    vmem_est = (2 * 2 * row_tile * npad                 # adj tile (bf16, double-buf)
                + 2 * 4 * row_tile * npad               # one head's scores + exp (f32)
                + npad * 4 * hidden * isz               # QKVS scratch
                + npad * hidden * 4                     # activation carry scratch
                + 2 * 4 * hidden * (in_dim + hidden + 2) * isz   # weights (2 live)
                + 2 * 4 * (row_tile * out_p + npad * in_dim))
    vmem_limit = int(min(max(2 * vmem_est, 32 * 2 ** 20), 100 * 2 ** 20))

    kern = partial(_graph_trans_kernel, heads=heads, row_tile=row_tile, md=md,
                   approx_recip=(jnp.dtype(md) != jnp.float32))
    out = pl.pallas_call(
        kern,
        grid=grid,
        in_specs=in_specs,
        out_specs=out_specs,
        out_shape=jax.ShapeDtypeStruct((npad, out_p), jnp.float32),
        scratch_shapes=[pltpu.VMEM((npad, 4 * hidden), md),        # QKVS (per stage)
                        pltpu.VMEM((npad, hidden), jnp.float32)],  # activation carry
        compiler_params=pltpu.CompilerParams(
            dimension_semantics=("arbitrary", "arbitrary"),
            vmem_limit_bytes=vmem_limit),
    )(x_p, adj_p, w0, b0, ln_g, ln_b, wb, bb, wo, bo)
    return out[:n, :out_dim]


# --------------------------------- reference (plain JAX) ----------------------------
def _ref_conv(x, adj, p, heads, relu, md=jnp.float32):
    dot = lambda a, b: jnp.dot(a.astype(md), b.astype(md),
                               preferred_element_type=jnp.float32)
    q = dot(x, p["wq"]) + p["bq"]
    k = dot(x, p["wk"]) + p["bk"]
    v = dot(x, p["wv"]) + p["bv"]
    skip = dot(x, p["ws"]) + p["bs"]
    d = q.shape[1] // heads
    outs = []
    for h in range(heads):
        qh, kh, vh = (a[:, h * d:(h + 1) * d] for a in (q, k, v))
        s = dot(qh, kh.T) / math.sqrt(d)
        s = jnp.where(adj > 0, s, -1e30)
        m = jnp.max(s, axis=-1, keepdims=True)
        e = jnp.exp(s - m) * adj
        den = jnp.sum(e, axis=-1, keepdims=True)
        alpha = e / jnp.where(den > 0, den, 1.0)
        outs.append(dot(alpha, vh))
    out = jnp.concatenate(outs, axis=1) + skip
    return jnp.maximum(out, 0.0) if relu else out


def _ref_forward(x, adj, params, heads, matmul_dtype=jnp.float32):
    md = matmul_dtype
    h = _ref_conv(x, adj, params["conv0"], heads, False, md)
    for ln_p, conv_p in params["blocks"]:
        mu = jnp.mean(h, axis=-1, keepdims=True)
        var = jnp.mean((h - mu) ** 2, axis=-1, keepdims=True)
        h = (h - mu) / jnp.sqrt(var + 1e-5) * ln_p["gamma"] + ln_p["beta"]
        h = _ref_conv(h, adj, conv_p, heads, True, md)
    return (jnp.dot(h.astype(md), params["out"]["w"].astype(md),
                    preferred_element_type=jnp.float32) + params["out"]["b"])


# ------------------------------------ param init ------------------------------------
def _init_conv_params(key, in_dim, out_dim):
    ks = jax.random.split(key, 8)
    f = lambda k, shp: (0.1 * jax.random.normal(k, shp)).astype(jnp.float32)
    return {
        "wq": f(ks[0], (in_dim, out_dim)), "bq": f(ks[1], (1, out_dim)),
        "wk": f(ks[2], (in_dim, out_dim)), "bk": f(ks[3], (1, out_dim)),
        "wv": f(ks[4], (in_dim, out_dim)), "bv": f(ks[5], (1, out_dim)),
        "ws": f(ks[6], (in_dim, out_dim)), "bs": f(ks[7], (1, out_dim)),
    }


def init_params(key, input_dim, hidden_dim, output_dim, num_heads, num_layers):
    keys = jax.random.split(key, num_layers + 2)
    params = {"conv0": _init_conv_params(keys[0], input_dim, hidden_dim), "blocks": []}
    for i in range(num_layers - 2):
        ln = {"gamma": jnp.ones((1, hidden_dim), jnp.float32),
              "beta": jnp.zeros((1, hidden_dim), jnp.float32)}
        conv = _init_conv_params(keys[1 + i], hidden_dim, hidden_dim)
        params["blocks"].append((ln, conv))
    kf = jax.random.split(keys[-1], 2)
    params["out"] = {
        "w": (0.1 * jax.random.normal(kf[0], (hidden_dim, output_dim))).astype(jnp.float32),
        "b": (0.1 * jax.random.normal(kf[1], (1, output_dim))).astype(jnp.float32),
    }
    return params


if __name__ == "__main__":
    key = jax.random.PRNGKey(0)

    # ---- test 1: small ring graph (single row tile) --------------------------------
    N, INPUT_DIM, HIDDEN_DIM, OUTPUT_DIM, NUM_LAYERS = 8, 8, 32, 4, 3
    kx, kp, kg = jax.random.split(key, 3)
    x = jax.random.normal(kx, (N, INPUT_DIM), dtype=jnp.float32)
    src = np.concatenate([np.arange(N), (np.arange(N) + 1) % N])
    dst = np.concatenate([(np.arange(N) + 1) % N, np.arange(N)])
    edge_index = jnp.asarray(np.stack([src, dst]), dtype=jnp.int32)
    # dense adjacency mask: adj[i, j] = 1 iff edge j -> i
    adj = jnp.zeros((N, N), jnp.float32).at[edge_index[1], edge_index[0]].set(1.0)
    params = init_params(kp, INPUT_DIM, HIDDEN_DIM, OUTPUT_DIM, NUM_HEADS, NUM_LAYERS)

    # default path: bf16 MXU operands, f32 accumulation / softmax / LayerNorm stats
    out = jax.block_until_ready(graph_trans_forward(x, adj, params, heads=NUM_HEADS))
    ref = _ref_forward(x, adj, params, NUM_HEADS, matmul_dtype=jnp.bfloat16)
    np.testing.assert_allclose(np.asarray(out), np.asarray(ref), rtol=5e-2, atol=5e-2)

    # f32 path (exact PyTorch-semantics check)
    out32 = jax.block_until_ready(
        graph_trans_forward(x, adj, params, heads=NUM_HEADS, matmul_dtype=jnp.float32))
    ref32 = _ref_forward(x, adj, params, NUM_HEADS, matmul_dtype=jnp.float32)
    np.testing.assert_allclose(np.asarray(out32), np.asarray(ref32),
                               rtol=1e-4, atol=1e-4)

    # ---- test 2: multi-tile, padded grid (N=20, row_tile=8 -> 3 tiles, 2 blocks) ---
    N2, L2 = 20, 4
    kx2, kp2, ka2 = jax.random.split(kg, 3)
    x2 = jax.random.normal(kx2, (N2, INPUT_DIM), dtype=jnp.float32)
    adj2 = (jax.random.uniform(ka2, (N2, N2)) < 0.3).astype(jnp.float32)
    params2 = init_params(kp2, INPUT_DIM, HIDDEN_DIM, OUTPUT_DIM, NUM_HEADS, L2)
    out2 = jax.block_until_ready(
        graph_trans_forward(x2, adj2, params2, heads=NUM_HEADS, row_tile=8))
    ref2 = _ref_forward(x2, adj2, params2, NUM_HEADS, matmul_dtype=jnp.bfloat16)
    np.testing.assert_allclose(np.asarray(out2), np.asarray(ref2),
                               rtol=5e-2, atol=5e-2)

    print("KERNEL_OK")
</pallas_src>

<mosaic_0001>
module attributes {stable_mosaic.version = 11 : i64} {
  func.func @_graph_trans_kernel(%arg0: i32, %arg1: i32, %arg2: memref<8x8xf32, #tpu.memory_space<vmem>>, %arg3: memref<8x8xbf16, #tpu.memory_space<vmem>>, %arg4: memref<8x128xbf16, #tpu.memory_space<vmem>>, %arg5: memref<1x128xf32, #tpu.memory_space<vmem>>, %arg6: memref<1x1x32xf32, #tpu.memory_space<vmem>>, %arg7: memref<1x1x32xf32, #tpu.memory_space<vmem>>, %arg8: memref<1x32x128xbf16, #tpu.memory_space<vmem>>, %arg9: memref<1x1x128xf32, #tpu.memory_space<vmem>>, %arg10: memref<32x128xbf16, #tpu.memory_space<vmem>>, %arg11: memref<1x128xf32, #tpu.memory_space<vmem>>, %arg12: memref<8x128xf32, #tpu.memory_space<vmem>>, %arg13: memref<8x128xbf16, #tpu.memory_space<vmem>>, %arg14: memref<8x32xf32, #tpu.memory_space<vmem>>) attributes {dimension_semantics = [#tpu.dimension_semantics<arbitrary>, #tpu.dimension_semantics<arbitrary>], iteration_bounds = array<i64: 2, 1>, scalar_prefetch = 0 : i64, scratch_operands = 2 : i64, tpu.core_type = #tpu.core_type<tc>, window_params = [{pipeline_mode = #tpu.pipeline_mode<synchronous>, transform_indices = @transform_0, window_bounds = array<i64: 8, 8>}, {transform_indices = @transform_1, window_bounds = array<i64: 8, 8>}, {pipeline_mode = #tpu.pipeline_mode<synchronous>, transform_indices = @transform_2, window_bounds = array<i64: 8, 128>}, {pipeline_mode = #tpu.pipeline_mode<synchronous>, transform_indices = @transform_3, window_bounds = array<i64: 1, 128>}, {transform_indices = @transform_4, window_bounds = array<i64: 1, 1, 32>}, {transform_indices = @transform_5, window_bounds = array<i64: 1, 1, 32>}, {transform_indices = @transform_6, window_bounds = array<i64: 1, 32, 128>}, {transform_indices = @transform_7, window_bounds = array<i64: 1, 1, 128>}, {pipeline_mode = #tpu.pipeline_mode<synchronous>, transform_indices = @transform_8, window_bounds = array<i64: 32, 128>}, {pipeline_mode = #tpu.pipeline_mode<synchronous>, transform_indices = @transform_9, window_bounds = array<i64: 1, 128>}, {transform_indices = @transform_10, window_bounds = array<i64: 8, 128>}]} {
    %c0_i32 = arith.constant 0 : i32
    %0 = arith.cmpi eq, %arg1, %c0_i32 : i32
    %1 = arith.extui %0 : i1 to i32
    %c0_i32_0 = arith.constant 0 : i32
    %2 = arith.cmpi ne, %1, %c0_i32_0 : i32
    scf.if %2 {
      %c0_i32_43 = arith.constant 0 : i32
      %107 = arith.cmpi eq, %arg0, %c0_i32_43 : i32
      %108 = arith.extui %107 : i1 to i32
      %c0_i32_44 = arith.constant 0 : i32
      %109 = arith.cmpi ne, %108, %c0_i32_44 : i32
      scf.if %109 {
        %c0_47 = arith.constant 0 : index
        %c0_48 = arith.constant 0 : index
        %113 = vector.load %arg2[%c0_47, %c0_48] : memref<8x8xf32, #tpu.memory_space<vmem>>, vector<8x8xf32>
        %114 = arith.truncf %113 : vector<8x8xf32> to vector<8x8xbf16>
        %c0_49 = arith.constant 0 : index
        %c0_50 = arith.constant 0 : index
        %115 = vector.load %arg4[%c0_49, %c0_50] : memref<8x128xbf16, #tpu.memory_space<vmem>>, vector<8x128xbf16>
        %cst_51 = arith.constant dense<0.000000e+00> : vector<8x128xf32>
        %116 = tpu.matmul %114, %115, %cst_51 {dimension_numbers = #tpu.dot_dimension_numbers<[1], [0], [0], [1], [0, 0, 1, 1], [], []>} : vector<8x8xbf16>, vector<8x128xbf16>, vector<8x128xf32> -> vector<8x128xf32>
        %c0_52 = arith.constant 0 : index
        %c0_53 = arith.constant 0 : index
        %117 = vector.load %arg5[%c0_52, %c0_53] : memref<1x128xf32, #tpu.memory_space<vmem>>, vector<1x128xf32>
        %118 = vector.broadcast %117 : vector<1x128xf32> to vector<8x128xf32>
        %119 = arith.addf %116, %118 : vector<8x128xf32>
        %120 = arith.truncf %119 : vector<8x128xf32> to vector<8x128xbf16>
        %c0_54 = arith.constant 0 : index
        %c0_55 = arith.constant 0 : index
        %121 = vector.load %arg13[%c0_54, %c0_55] : memref<8x128xbf16, #tpu.memory_space<vmem>>, vector<8x128xbf16>
        tpu.vector_store %arg13[%c0_54, %c0_55], %120 {strides = array<i32>} : memref<8x128xbf16, #tpu.memory_space<vmem>>, vector<8x128xbf16>,
      } else {
      }
      %c1_i32_45 = arith.constant 1 : i32
      %110 = arith.cmpi sge, %arg0, %c1_i32_45 : i32
      %111 = arith.extui %110 : i1 to i32
      %c0_i32_46 = arith.constant 0 : i32
      %112 = arith.cmpi ne, %111, %c0_i32_46 : i32
      scf.if %112 {
        %c0_47 = arith.constant 0 : index
        %c0_48 = arith.constant 0 : index
        %113 = vector.load %arg14[%c0_47, %c0_48] : memref<8x32xf32, #tpu.memory_space<vmem>>, vector<8x32xf32>
        %cst_49 = arith.constant dense<0.000000e+00> : vector<8xf32>
        %114 = vector.multi_reduction <add>, %113, %cst_49 [1] : vector<8x32xf32> to vector<8xf32>
        %115 = vector.shape_cast %114 : vector<8xf32> to vector<8x1xf32>
        %cst_50 = arith.constant 3.200000e+01 : f32
        %116 = vector.broadcast %cst_50 : f32 to vector<8x1xf32>
        %117 = arith.divf %115, %116 : vector<8x1xf32>
        %118 = vector.broadcast %117 : vector<8x1xf32> to vector<8x32xf32>
        %119 = arith.subf %113, %118 : vector<8x32xf32>
        %120 = arith.mulf %119, %119 : vector<8x32xf32>
        %cst_51 = arith.constant dense<0.000000e+00> : vector<8xf32>
        %121 = vector.multi_reduction <add>, %120, %cst_51 [1] : vector<8x32xf32> to vector<8xf32>
        %122 = vector.shape_cast %121 : vector<8xf32> to vector<8x1xf32>
        %cst_52 = arith.constant 3.200000e+01 : f32
        %123 = vector.broadcast %cst_52 : f32 to vector<8x1xf32>
        %124 = arith.divf %122, %123 : vector<8x1xf32>
        %cst_53 = arith.constant 9.99999974E-6 : f32
        %125 = vector.broadcast %cst_53 : f32 to vector<8x1xf32>
        %126 = arith.addf %124, %125 : vector<8x1xf32>
        %127 = math.rsqrt %126 : vector<8x1xf32>
        %128 = vector.broadcast %127 : vector<8x1xf32> to vector<8x32xf32>
        %129 = arith.mulf %119, %128 : vector<8x32xf32>
        %c0_54 = arith.constant 0 : index
        %c0_55 = arith.constant 0 : index
        %c0_56 = arith.constant 0 : index
        %130 = vector.load %arg6[%c0_54, %c0_55, %c0_56] : memref<1x1x32xf32, #tpu.memory_space<vmem>>, vector<1x1x32xf32>
        %131 = vector.shape_cast %130 : vector<1x1x32xf32> to vector<1x32xf32>
        %132 = vector.broadcast %131 : vector<1x32xf32> to vector<8x32xf32>
        %133 = arith.mulf %129, %132 : vector<8x32xf32>
        %c0_57 = arith.constant 0 : index
        %c0_58 = arith.constant 0 : index
        %c0_59 = arith.constant 0 : index
        %134 = vector.load %arg7[%c0_57, %c0_58, %c0_59] : memref<1x1x32xf32, #tpu.memory_space<vmem>>, vector<1x1x32xf32>
        %135 = vector.shape_cast %134 : vector<1x1x32xf32> to vector<1x32xf32>
        %136 = vector.broadcast %135 : vector<1x32xf32> to vector<8x32xf32>
        %137 = arith.addf %133, %136 : vector<8x32xf32>
        %138 = arith.truncf %137 : vector<8x32xf32> to vector<8x32xbf16>
        %c0_60 = arith.constant 0 : index
        %c0_61 = arith.constant 0 : index
        %c0_62 = arith.constant 0 : index
        %139 = vector.load %arg8[%c0_60, %c0_61, %c0_62] : memref<1x32x128xbf16, #tpu.memory_space<vmem>>, vector<1x32x128xbf16>
        %140 = vector.shape_cast %139 : vector<1x32x128xbf16> to vector<32x128xbf16>
        %cst_63 = arith.constant dense<0.000000e+00> : vector<8x128xf32>
        %141 = tpu.matmul %138, %140, %cst_63 {dimension_numbers = #tpu.dot_dimension_numbers<[1], [0], [0], [1], [0, 0, 1, 1], [], []>} : vector<8x32xbf16>, vector<32x128xbf16>, vector<8x128xf32> -> vector<8x128xf32>
        %c0_64 = arith.constant 0 : index
        %c0_65 = arith.constant 0 : index
        %c0_66 = arith.constant 0 : index
        %142 = vector.load %arg9[%c0_64, %c0_65, %c0_66] : memref<1x1x128xf32, #tpu.memory_space<vmem>>, vector<1x1x128xf32>
        %143 = vector.shape_cast %142 : vector<1x1x128xf32> to vector<1x128xf32>
        %144 = vector.broadcast %143 : vector<1x128xf32> to vector<8x128xf32>
        %145 = arith.addf %141, %144 : vector<8x128xf32>
        %146 = arith.truncf %145 : vector<8x128xf32> to vector<8x128xbf16>
        %c0_67 = arith.constant 0 : index
        %c0_68 = arith.constant 0 : index
        %147 = vector.load %arg13[%c0_67, %c0_68] : memref<8x128xbf16, #tpu.memory_space<vmem>>, vector<8x128xbf16>
        tpu.vector_store %arg13[%c0_67, %c0_68], %146 {strides = array<i32>} : memref<8x128xbf16, #tpu.memory_space<vmem>>, vector<8x128xbf16>,
      } else {
      }
    } else {
    }
    %c8_i32 = arith.constant 8 : i32
    %3 = arith.muli %arg1, %c8_i32 : i32
    %4 = tpu.assume_multiple %3, 8 : i32
    %c0 = arith.constant 0 : index
    %c0_1 = arith.constant 0 : index
    %5 = vector.load %arg3[%c0, %c0_1] : memref<8x8xbf16, #tpu.memory_space<vmem>>, vector<8x8xbf16>
    %cst = arith.constant 0.000000e+00 : bf16
    %6 = vector.broadcast %cst : bf16 to vector<8x8xbf16>
    %7 = arith.cmpf ogt, %5, %6 : vector<8x8xbf16>
    %cst_2 = arith.constant dense<0xFF80> : vector<8xbf16>
    %8 = vector.multi_reduction <maximumf>, %5, %cst_2 [1] : vector<8x8xbf16> to vector<8xbf16>
    %9 = vector.shape_cast %8 : vector<8xbf16> to vector<8x1xbf16>
    %cst_3 = arith.constant 0.000000e+00 : bf16
    %10 = vector.broadcast %cst_3 : bf16 to vector<8x1xbf16>
    %11 = arith.cmpf ogt, %9, %10 : vector<8x1xbf16>
    %12 = arith.index_cast %4 : i32 to index
    %c0_4 = arith.constant 0 : index
    %13 = vector.load %arg13[%12, %c0_4] : memref<8x128xbf16, #tpu.memory_space<vmem>>, vector<8x128xbf16>
    %14 = vector.extract_strided_slice %13 {offsets = [0, 0], sizes = [8, 8], strides = [1, 1]} : vector<8x128xbf16> to vector<8x8xbf16>
    %c0_5 = arith.constant 0 : index
    %c32 = arith.constant 32 : index
    %15 = vector.load %arg13[%c0_5, %c32] : memref<8x128xbf16, #tpu.memory_space<vmem>>, vector<8x8xbf16>
    %c0_6 = arith.constant 0 : index
    %c64 = arith.constant 64 : index
    %16 = vector.load %arg13[%c0_6, %c64] : memref<8x128xbf16, #tpu.memory_space<vmem>>, vector<8x8xbf16>
    %cst_7 = arith.constant dense<0.000000e+00> : vector<8x8xf32>
    %17 = tpu.matmul %14, %15, %cst_7 {dimension_numbers = #tpu.dot_dimension_numbers<[1], [1], [0], [0], [0, 0, 1, 0], [], []>} : vector<8x8xbf16>, vector<8x8xbf16>, vector<8x8xf32> -> vector<8x8xf32>
    %cst_8 = arith.constant -1.000000e+30 : f32
    %18 = vector.broadcast %cst_8 : f32 to vector<8x8xf32>
    %19 = arith.select %7, %17, %18 : vector<8x8xi1>, vector<8x8xf32>
    %cst_9 = arith.constant dense<0xFF800000> : vector<8xf32>
    %20 = vector.multi_reduction <maximumf>, %19, %cst_9 [1] : vector<8x8xf32> to vector<8xf32>
    %21 = vector.shape_cast %20 : vector<8xf32> to vector<8x1xf32>
    %22 = vector.broadcast %21 : vector<8x1xf32> to vector<8x8xf32>
    %23 = arith.subf %19, %22 : vector<8x8xf32>
    %24 = math.exp %23 : vector<8x8xf32>
    %cst_10 = arith.constant dense<0.000000e+00> : vector<8xf32>
    %25 = vector.multi_reduction <add>, %24, %cst_10 [1] : vector<8x8xf32> to vector<8xf32>
    %26 = vector.shape_cast %25 : vector<8xf32> to vector<8x1xf32>
    %27 = arith.truncf %24 : vector<8x8xf32> to vector<8x8xbf16>
    %cst_11 = arith.constant dense<0.000000e+00> : vector<8x8xf32>
    %28 = tpu.matmul %27, %16, %cst_11 {dimension_numbers = #tpu.dot_dimension_numbers<[1], [0], [0], [1], [0, 0, 1, 1], [], []>} : vector<8x8xbf16>, vector<8x8xbf16>, vector<8x8xf32> -> vector<8x8xf32>
    %29 = tpu.reciprocal %26 {approx = true} : vector<8x1xf32> -> vector<8x1xf32>
    %30 = vector.broadcast %29 : vector<8x1xf32> to vector<8x8xf32>
    %31 = arith.mulf %28, %30 : vector<8x8xf32>
    %32 = vector.extract_strided_slice %13 {offsets = [0, 8], sizes = [8, 8], strides = [1, 1]} : vector<8x128xbf16> to vector<8x8xbf16>
    %c0_12 = arith.constant 0 : index
    %c40 = arith.constant 40 : index
    %33 = vector.load %arg13[%c0_12, %c40] : memref<8x128xbf16, #tpu.memory_space<vmem>>, vector<8x8xbf16>
    %c0_13 = arith.constant 0 : index
    %c72 = arith.constant 72 : index
    %34 = vector.load %arg13[%c0_13, %c72] : memref<8x128xbf16, #tpu.memory_space<vmem>>, vector<8x8xbf16>
    %cst_14 = arith.constant dense<0.000000e+00> : vector<8x8xf32>
    %35 = tpu.matmul %32, %33, %cst_14 {dimension_numbers = #tpu.dot_dimension_numbers<[1], [1], [0], [0], [0, 0, 1, 0], [], []>} : vector<8x8xbf16>, vector<8x8xbf16>, vector<8x8xf32> -> vector<8x8xf32>
    %cst_15 = arith.constant -1.000000e+30 : f32
    %36 = vector.broadcast %cst_15 : f32 to vector<8x8xf32>
    %37 = arith.select %7, %35, %36 : vector<8x8xi1>, vector<8x8xf32>
    %cst_16 = arith.constant dense<0xFF800000> : vector<8xf32>
    %38 = vector.multi_reduction <maximumf>, %37, %cst_16 [1] : vector<8x8xf32> to vector<8xf32>
    %39 = vector.shape_cast %38 : vector<8xf32> to vector<8x1xf32>
    %40 = vector.broadcast %39 : vector<8x1xf32> to vector<8x8xf32>
    %41 = arith.subf %37, %40 : vector<8x8xf32>
    %42 = math.exp %41 : vector<8x8xf32>
    %cst_17 = arith.constant dense<0.000000e+00> : vector<8xf32>
    %43 = vector.multi_reduction <add>, %42, %cst_17 [1] : vector<8x8xf32> to vector<8xf32>
    %44 = vector.shape_cast %43 : vector<8xf32> to vector<8x1xf32>
    %45 = arith.truncf %42 : vector<8x8xf32> to vector<8x8xbf16>
    %cst_18 = arith.constant dense<0.000000e+00> : vector<8x8xf32>
    %46 = tpu.matmul %45, %34, %cst_18 {dimension_numbers = #tpu.dot_dimension_numbers<[1], [0], [0], [1], [0, 0, 1, 1], [], []>} : vector<8x8xbf16>, vector<8x8xbf16>, vector<8x8xf32> -> vector<8x8xf32>
    %47 = tpu.reciprocal %44 {approx = true} : vector<8x1xf32> -> vector<8x1xf32>
    %48 = vector.broadcast %47 : vector<8x1xf32> to vector<8x8xf32>
    %49 = arith.mulf %46, %48 : vector<8x8xf32>
    %50 = vector.extract_strided_slice %13 {offsets = [0, 16], sizes = [8, 8], strides = [1, 1]} : vector<8x128xbf16> to vector<8x8xbf16>
    %c0_19 = arith.constant 0 : index
    %c48 = arith.constant 48 : index
    %51 = vector.load %arg13[%c0_19, %c48] : memref<8x128xbf16, #tpu.memory_space<vmem>>, vector<8x8xbf16>
    %c0_20 = arith.constant 0 : index
    %c80 = arith.constant 80 : index
    %52 = vector.load %arg13[%c0_20, %c80] : memref<8x128xbf16, #tpu.memory_space<vmem>>, vector<8x8xbf16>
    %cst_21 = arith.constant dense<0.000000e+00> : vector<8x8xf32>
    %53 = tpu.matmul %50, %51, %cst_21 {dimension_numbers = #tpu.dot_dimension_numbers<[1], [1], [0], [0], [0, 0, 1, 0], [], []>} : vector<8x8xbf16>, vector<8x8xbf16>, vector<8x8xf32> -> vector<8x8xf32>
    %cst_22 = arith.constant -1.000000e+30 : f32
    %54 = vector.broadcast %cst_22 : f32 to vector<8x8xf32>
    %55 = arith.select %7, %53, %54 : vector<8x8xi1>, vector<8x8xf32>
    %cst_23 = arith.constant dense<0xFF800000> : vector<8xf32>
    %56 = vector.multi_reduction <maximumf>, %55, %cst_23 [1] : vector<8x8xf32> to vector<8xf32>
    %57 = vector.shape_cast %56 : vector<8xf32> to vector<8x1xf32>
    %58 = vector.broadcast %57 : vector<8x1xf32> to vector<8x8xf32>
    %59 = arith.subf %55, %58 : vector<8x8xf32>
    %60 = math.exp %59 : vector<8x8xf32>
    %cst_24 = arith.constant dense<0.000000e+00> : vector<8xf32>
    %61 = vector.multi_reduction <add>, %60, %cst_24 [1] : vector<8x8xf32> to vector<8xf32>
    %62 = vector.shape_cast %61 : vector<8xf32> to vector<8x1xf32>
    %63 = arith.truncf %60 : vector<8x8xf32> to vector<8x8xbf16>
    %cst_25 = arith.constant dense<0.000000e+00> : vector<8x8xf32>
    %64 = tpu.matmul %63, %52, %cst_25 {dimension_numbers = #tpu.dot_dimension_numbers<[1], [0], [0], [1], [0, 0, 1, 1], [], []>} : vector<8x8xbf16>, vector<8x8xbf16>, vector<8x8xf32> -> vector<8x8xf32>
    %65 = tpu.reciprocal %62 {approx = true} : vector<8x1xf32> -> vector<8x1xf32>
    %66 = vector.broadcast %65 : vector<8x1xf32> to vector<8x8xf32>
    %67 = arith.mulf %64, %66 : vector<8x8xf32>
    %68 = vector.extract_strided_slice %13 {offsets = [0, 24], sizes = [8, 8], strides = [1, 1]} : vector<8x128xbf16> to vector<8x8xbf16>
    %c0_26 = arith.constant 0 : index
    %c56 = arith.constant 56 : index
    %69 = vector.load %arg13[%c0_26, %c56] : memref<8x128xbf16, #tpu.memory_space<vmem>>, vector<8x8xbf16>
    %c0_27 = arith.constant 0 : index
    %c88 = arith.constant 88 : index
    %70 = vector.load %arg13[%c0_27, %c88] : memref<8x128xbf16, #tpu.memory_space<vmem>>, vector<8x8xbf16>
    %cst_28 = arith.constant dense<0.000000e+00> : vector<8x8xf32>
    %71 = tpu.matmul %68, %69, %cst_28 {dimension_numbers = #tpu.dot_dimension_numbers<[1], [1], [0], [0], [0, 0, 1, 0], [], []>} : vector<8x8xbf16>, vector<8x8xbf16>, vector<8x8xf32> -> vector<8x8xf32>
    %cst_29 = arith.constant -1.000000e+30 : f32
    %72 = vector.broadcast %cst_29 : f32 to vector<8x8xf32>
    %73 = arith.select %7, %71, %72 : vector<8x8xi1>, vector<8x8xf32>
    %cst_30 = arith.constant dense<0xFF800000> : vector<8xf32>
    %74 = vector.multi_reduction <maximumf>, %73, %cst_30 [1] : vector<8x8xf32> to vector<8xf32>
    %75 = vector.shape_cast %74 : vector<8xf32> to vector<8x1xf32>
    %76 = vector.broadcast %75 : vector<8x1xf32> to vector<8x8xf32>
    %77 = arith.subf %73, %76 : vector<8x8xf32>
    %78 = math.exp %77 : vector<8x8xf32>
    %cst_31 = arith.constant dense<0.000000e+00> : vector<8xf32>
    %79 = vector.multi_reduction <add>, %78, %cst_31 [1] : vector<8x8xf32> to vector<8xf32>
    %80 = vector.shape_cast %79 : vector<8xf32> to vector<8x1xf32>
    %81 = arith.truncf %78 : vector<8x8xf32> to vector<8x8xbf16>
    %cst_32 = arith.constant dense<0.000000e+00> : vector<8x8xf32>
    %82 = tpu.matmul %81, %70, %cst_32 {dimension_numbers = #tpu.dot_dimension_numbers<[1], [0], [0], [1], [0, 0, 1, 1], [], []>} : vector<8x8xbf16>, vector<8x8xbf16>, vector<8x8xf32> -> vector<8x8xf32>
    %83 = tpu.reciprocal %80 {approx = true} : vector<8x1xf32> -> vector<8x1xf32>
    %84 = vector.broadcast %83 : vector<8x1xf32> to vector<8x8xf32>
    %85 = arith.mulf %82, %84 : vector<8x8xf32>
    %86 = tpu.concatenate %31, %49, %67, %85 in 1 : vector<8x8xf32>, vector<8x8xf32>, vector<8x8xf32>, vector<8x8xf32> -> vector<8x32xf32>
    %87 = vector.extract_strided_slice %13 {offsets = [0, 96], sizes = [8, 32], strides = [1, 1]} : vector<8x128xbf16> to vector<8x32xbf16>
    %88 = arith.extf %87 : vector<8x32xbf16> to vector<8x32xf32>
    %cst_33 = arith.constant 0.000000e+00 : f32
    %89 = vector.shape_cast %11 : vector<8x1xi1> to vector<8x1xi1>
    %90 = vector.broadcast %89 : vector<8x1xi1> to vector<8x32xi1>
    %91 = vector.broadcast %cst_33 : f32 to vector<8x32xf32>
    %92 = arith.select %90, %86, %91 : vector<8x32xi1>, vector<8x32xf32>
    %93 = arith.addf %92, %88 : vector<8x32xf32>
    %c1_i32 = arith.constant 1 : i32
    %94 = arith.cmpi sge, %arg0, %c1_i32 : i32
    %cst_34 = arith.constant 0.000000e+00 : f32
    %95 = vector.broadcast %cst_34 : f32 to vector<8x32xf32>
    %96 = arith.maximumf %93, %95 : vector<8x32xf32>
    %97 = arith.select %94, %96, %93 : vector<8x32xf32>
    %98 = arith.index_cast %4 : i32 to index
    %c0_35 = arith.constant 0 : index
    %99 = vector.load %arg14[%98, %c0_35] : memref<8x32xf32, #tpu.memory_space<vmem>>, vector<8x32xf32>
    tpu.vector_store %arg14[%98, %c0_35], %97 {strides = array<i32>} : memref<8x32xf32, #tpu.memory_space<vmem>>, vector<8x32xf32>,
    %100 = arith.truncf %97 : vector<8x32xf32> to vector<8x32xbf16>
    %c0_36 = arith.constant 0 : index
    %c0_37 = arith.constant 0 : index
    %101 = vector.load %arg10[%c0_36, %c0_37] : memref<32x128xbf16, #tpu.memory_space<vmem>>, vector<32x128xbf16>
    %cst_38 = arith.constant dense<0.000000e+00> : vector<8x128xf32>
    %102 = tpu.matmul %100, %101, %cst_38 {dimension_numbers = #tpu.dot_dimension_numbers<[1], [0], [0], [1], [0, 0, 1, 1], [], []>} : vector<8x32xbf16>, vector<32x128xbf16>, vector<8x128xf32> -> vector<8x128xf32>
    %c0_39 = arith.constant 0 : index
    %c0_40 = arith.constant 0 : index
    %103 = vector.load %arg11[%c0_39, %c0_40] : memref<1x128xf32, #tpu.memory_space<vmem>>, vector<1x128xf32>
    %104 = vector.broadcast %103 : vector<1x128xf32> to vector<8x128xf32>
    %105 = arith.addf %102, %104 : vector<8x128xf32>
    %c0_41 = arith.constant 0 : index
    %c0_42 = arith.constant 0 : index
    %106 = vector.load %arg12[%c0_41, %c0_42] : memref<8x128xf32, #tpu.memory_space<vmem>>, vector<8x128xf32>
    tpu.vector_store %arg12[%c0_41, %c0_42], %105 {strides = array<i32>} : memref<8x128xf32, #tpu.memory_space<vmem>>, vector<8x128xf32>,
    return
  }
  func.func @transform_0(%arg0: i32, %arg1: i32) -> (i32, i32) {
    %c0_i32 = arith.constant 0 : i32
    %c0_i32_0 = arith.constant 0 : i32
    %c0_i32_1 = arith.constant 0 : i32
    return %c0_i32, %c0_i32_0 : i32, i32
  }
  func.func @transform_1(%arg0: i32, %arg1: i32) -> (i32, i32) {
    %c0_i32 = arith.constant 0 : i32
    %c0_i32_0 = arith.constant 0 : i32
    return %arg1, %c0_i32 : i32, i32
  }
  func.func @transform_2(%arg0: i32, %arg1: i32) -> (i32, i32) {
    %c0_i32 = arith.constant 0 : i32
    %c0_i32_0 = arith.constant 0 : i32
    %c0_i32_1 = arith.constant 0 : i32
    return %c0_i32, %c0_i32_0 : i32, i32
  }
  func.func @transform_3(%arg0: i32, %arg1: i32) -> (i32, i32) {
    %c0_i32 = arith.constant 0 : i32
    %c0_i32_0 = arith.constant 0 : i32
    %c0_i32_1 = arith.constant 0 : i32
    return %c0_i32, %c0_i32_0 : i32, i32
  }
  func.func @transform_4(%arg0: i32, %arg1: i32) -> (i32, i32, i32) {
    %c1_i32 = arith.constant 1 : i32
    %0 = arith.subi %arg0, %c1_i32 : i32
    %c0_i32 = arith.constant 0 : i32
    %1 = arith.maxsi %0, %c0_i32 : i32
    %c0_i32_0 = arith.constant 0 : i32
    %2 = arith.minsi %1, %c0_i32_0 : i32
    %c0_i32_1 = arith.constant 0 : i32
    %c0_i32_2 = arith.constant 0 : i32
    %c0_i32_3 = arith.constant 0 : i32
    return %2, %c0_i32_1, %c0_i32_2 : i32, i32, i32
  }
  func.func @transform_5(%arg0: i32, %arg1: i32) -> (i32, i32, i32) {
    %c1_i32 = arith.constant 1 : i32
    %0 = arith.subi %arg0, %c1_i32 : i32
    %c0_i32 = arith.constant 0 : i32
    %1 = arith.maxsi %0, %c0_i32 : i32
    %c0_i32_0 = arith.constant 0 : i32
    %2 = arith.minsi %1, %c0_i32_0 : i32
    %c0_i32_1 = arith.constant 0 : i32
    %c0_i32_2 = arith.constant 0 : i32
    %c0_i32_3 = arith.constant 0 : i32
    return %2, %c0_i32_1, %c0_i32_2 : i32, i32, i32
  }
  func.func @transform_6(%arg0: i32, %arg1: i32) -> (i32, i32, i32) {
    %c1_i32 = arith.constant 1 : i32
    %0 = arith.subi %arg0, %c1_i32 : i32
    %c0_i32 = arith.constant 0 : i32
    %1 = arith.maxsi %0, %c0_i32 : i32
    %c0_i32_0 = arith.constant 0 : i32
    %2 = arith.minsi %1, %c0_i32_0 : i32
    %c0_i32_1 = arith.constant 0 : i32
    %c0_i32_2 = arith.constant 0 : i32
    %c0_i32_3 = arith.constant 0 : i32
    return %2, %c0_i32_1, %c0_i32_2 : i32, i32, i32
  }
  func.func @transform_7(%arg0: i32, %arg1: i32) -> (i32, i32, i32) {
    %c1_i32 = arith.constant 1 : i32
    %0 = arith.subi %arg0, %c1_i32 : i32
    %c0_i32 = arith.constant 0 : i32
    %1 = arith.maxsi %0, %c0_i32 : i32
    %c0_i32_0 = arith.constant 0 : i32
    %2 = arith.minsi %1, %c0_i32_0 : i32
    %c0_i32_1 = arith.constant 0 : i32
    %c0_i32_2 = arith.constant 0 : i32
    %c0_i32_3 = arith.constant 0 : i32
    return %2, %c0_i32_1, %c0_i32_2 : i32, i32, i32
  }
  func.func @transform_8(%arg0: i32, %arg1: i32) -> (i32, i32) {
    %c0_i32 = arith.constant 0 : i32
    %c0_i32_0 = arith.constant 0 : i32
    %c0_i32_1 = arith.constant 0 : i32
    return %c0_i32, %c0_i32_0 : i32, i32
  }
  func.func @transform_9(%arg0: i32, %arg1: i32) -> (i32, i32) {
    %c0_i32 = arith.constant 0 : i32
    %c0_i32_0 = arith.constant 0 : i32
    %c0_i32_1 = arith.constant 0 : i32
    return %c0_i32, %c0_i32_0 : i32, i32
  }
  func.func @transform_10(%arg0: i32, %arg1: i32) -> (i32, i32) {
    %c0_i32 = arith.constant 0 : i32
    %c0_i32_0 = arith.constant 0 : i32
    return %arg1, %c0_i32 : i32, i32
  }
}

</mosaic_0001>

<bundles_post_ra>
// kernel: tpu_custom_call.1
= control target key start
LH: loop header
LB: loop body
LE: loop exit
PB: predicated region body
PF: predicated region fallthrough
CT: control target
= control target key end

     0   :  { %s2379_s0 = inlined_call_operand.hbm [shape: f32[8,8], index: 0, kind: input, shape index: {}]   ;;  %s2380_s1 = inlined_call_operand.hbm [shape: bf16[8,8], index: 1, kind: input, shape index: {}]   ;;  %s2381_s2 = inlined_call_operand.vmem [shape: bf16[8,128], index: 2, kind: input, shape index: {}]   ;;  %s2382_s3 = inlined_call_operand.vmem [shape: f32[1,128], index: 3, kind: input, shape index: {}]   ;;  %s2383_s4 = inlined_call_operand.vmem [shape: f32[1,1,32], index: 4, kind: input, shape index: {}]   ;;  %s2384_s5 = inlined_call_operand.hbm [shape: f32[1,1,32], index: 5, kind: input, shape index: {}]   ;;  %s2385_s6 = inlined_call_operand.vmem [shape: bf16[1,32,128], index: 6, kind: input, shape index: {}]   ;;  %s2386_s7 = inlined_call_operand.vmem [shape: f32[1,1,128], index: 7, kind: input, shape index: {}]   ;;  %s2387_s8 = inlined_call_operand.hbm [shape: bf16[32,128], index: 8, kind: input, shape index: {}]   ;;  %s2388_s9 = inlined_call_operand.vmem [shape: f32[1,128], index: 9, kind: input, shape index: {}]   ;;  %s2389_s10 = inlined_call_operand.hbm [shape: f32[8,128], index: 10, kind: output, shape index: {}]  }
   0x1   :  { %2392 = sst [smem:[#allocation17_spill]] %s2379_s0 }
   0x2   :  { %15 = vsyncpa [#allocation5], 0 }
   0x3   :  { %16 = vsyncpa [#allocation8], 0 }
   0x4   :  { %17 = vsyncpa [#allocation6], 0  ;;  %s2073_s13 = smov 0   ;;  %s2075_s14 = smov 0  }
   0x5   :  { %s2077_s15 = smov 0  }
   0x6 LB: > { %s2089_s16 = sadd.s32 4294967295, %s1987_s15   ;;  %s35_s17 = sadd.s32 1, %s1983_s14  ;;  %s1987_s15 = sphi %s2077_s15, %s23_s15   ;;  %s1983_s14 = sphi %s2075_s14, %s2411_s14   ;;  %s1979_s13 = sphi %s2073_s13, %s2410_s13  }
   0x7   : > { %p37_p0 = scmp.ge.s32.totalorder %s35_s17, 2  ;;  %p2390_p1 = scmp.eq.s32.totalorder %s2089_s16, 0 }
   0x8   : > { %p1530_p2 = scmp.ge.s32.totalorder %s1987_s15, 1  ;;  %p341_p3 = scmp.lt.s32.totalorder %s1987_s15, 3 }
   0x9   : > { %s2413_s17 = smov (%p37_p0, %s35_s17), 0  ;;  %s1989_s19 = smov [#allocation4]  }
   0xa   : > { %p2097_p4 = pnand %p1530_p2, %p341_p3  ;;  %s354_s20 = sshll.u32 %s1989_s19, 4  ;;  %s355_s20 = int_to_ptr.vmem [resolvable:$true] %s354_s20 }
   0xb   : > { %s1990_s22 = smov [#allocation7]   ;;  %s1991_s24 = smov [#allocation10]  }
   0xc   : > { %s2393_s18 = scalar_select %p2097_p4, 1, 0 }
   0xd   : > { %p1706_p5 = pneg %p2097_p4  ;;  %s367_s23 = sshll.u32 %s1990_s22, 4  ;;  %s2109_s23 = int_to_ptr.vmem [resolvable:$true] %s367_s23 }
   0xe   : > { %s2111_s25 = sshll.u32 %s1991_s24, 4  ;;  %s2395_s0 = sld [smem:[#allocation17_spill]]  ;;  %s384_s25 = int_to_ptr.vmem [resolvable:$true] %s2111_s25 }
   0xf   : > { %p2105_p6 = pnand %p1706_p5, %p2390_p1 }
  0x11   : > { %p2121_p8 = pneg %p2105_p6 }
  0x14   : > { %s1807_s28 = scalar_lea.hbm %s2395_s0, 128 }
  0x15   : > { %p1808_p7 = scmp.ne.s32.totalorder %s2395_s0, %s1807_s28  ;;  %p1814_p11 = scmp.lt.u32.totalorder %s1807_s28, %s2395_s0 }
  0x17   : > { %p1810_p9 = pnand %p2121_p8, %p1808_p7 }
  0x19   : > { %p1811_p10 = pneg %p1810_p9 }
  0x1b   : > { %p1816_p12 = pnand %p1814_p11, %p1811_p10 }
  0x1d   : > { %1819 = shalt.err (!%p1816_p12)
}
  0x1e   : > { %s1820_s22 = scalar_lea.vmem %s355_s20, 128  ;;  %p1828_p3 = scmp.lt.s32.totalorder %s355_s20, %s355_s20 }
  0x1f   : > { %p1821_p13 = scmp.ne.s32.totalorder %s355_s20, %s1820_s22  ;;  %p1829_p5 = scmp.lt.s32.totalorder %s1820_s22, %s1820_s22 }
  0x21   : > { %p1823_p0 = pnand %p1821_p13, %p2121_p8  ;;  %p1830_p1 = por %p1829_p5, %p1828_p3 }
  0x23   : > { %p1824_p2 = pneg %p1823_p0 }
  0x25   : > { %p1831_p4 = pnand %p1830_p1, %p1824_p2 }
  0x27   : > { %1834 = shalt.err (!%p1831_p4)
}
  0x28   : > { %1709 = dma.hbm_to_vmem [thread:$0]  (!%p2105_p6), %s2395_s0, 128, %s355_s20, [#allocation5]  }
  0x29   : > { %s1835_s29 = scalar_lea.hbm %s2380_s1, 64 }
  0x2a   : > { %p1836_p7 = scmp.ne.s32.totalorder %s2380_s1, %s1835_s29  ;;  %p1842_p1 = scmp.lt.u32.totalorder %s1835_s29, %s2380_s1 }
  0x2c   : > { %p1838_p9 = pnand %p1836_p7, %p2121_p8 }
  0x2e   : > { %p1839_p10 = pneg %p1838_p9 }
  0x30   : > { %p1844_p4 = pnand %p1842_p1, %p1839_p10 }
  0x32   : > { %1847 = shalt.err (!%p1844_p4)
}
  0x33   : > { %s1848_s20 = scalar_lea.vmem %s2109_s23, 64  ;;  %p1856_p0 = scmp.lt.s32.totalorder %s2109_s23, %s2109_s23 }
  0x34   : > { %p1849_p11 = scmp.ne.s32.totalorder %s2109_s23, %s1848_s20  ;;  %p1857_p2 = scmp.lt.s32.totalorder %s1848_s20, %s1848_s20 }
  0x36   : > { %p1851_p12 = pnand %p1849_p11, %p2121_p8  ;;  %p1858_p3 = por %p1857_p2, %p1856_p0 }
  0x38   : > { %p1852_p13 = pneg %p1851_p12 }
  0x3a   : > { %p1859_p5 = pnand %p1858_p3, %p1852_p13 }
  0x3c   : > { %1862 = shalt.err (!%p1859_p5)
}
  0x3d   : > { %1712 = dma.hbm_to_vmem [thread:$0]  (!%p2105_p6), %s2380_s1, 64, %s2109_s23, [#allocation8]  }
  0x3e   : > { %s1863_s29 = scalar_lea.hbm %s2387_s8, 256 }
  0x3f   : > { %p1864_p9 = scmp.ne.s32.totalorder %s2387_s8, %s1863_s29  ;;  %p1870_p4 = scmp.lt.u32.totalorder %s1863_s29, %s2387_s8 }
  0x41   : > { %p1866_p10 = pnand %p1864_p9, %p2121_p8 }
  0x43   : > { %p1867_p1 = pneg %p1866_p10 }
  0x45   : > { %p1872_p11 = pnand %p1870_p4, %p1867_p1 }
  0x47   : > { %1875 = shalt.err (!%p1872_p11)
}
  0x48   : > { %s1876_s23 = scalar_lea.vmem %s384_s25, 256  ;;  %p1884_p2 = scmp.lt.s32.totalorder %s384_s25, %s384_s25 }
  0x49   : > { %p1877_p12 = scmp.ne.s32.totalorder %s384_s25, %s1876_s23  ;;  %p1885_p3 = scmp.lt.s32.totalorder %s1876_s23, %s1876_s23 }
  0x4b   : > { %p1879_p13 = pnand %p1877_p12, %p2121_p8  ;;  %p1886_p5 = por %p1885_p3, %p1884_p2 }
  0x4d   : > { %p1880_p0 = pneg %p1879_p13 }
  0x4f   : > { %p1887_p7 = pnand %p1886_p5, %p1880_p0 }
  0x51   : > { %1890 = shalt.err (!%p1887_p7)
}
  0x52   : > { %s1992_s20 = smov 64   ;;  %s1993_s24 = smov 4  }
  0x53   : > { %1715 = dma.hbm_to_vmem [thread:$0]  (!%p2105_p6), %s2387_s8, 256, %s384_s25, [#allocation8], %s1992_s20, %s1992_s20, %s1993_s24  }
  0x54   : > { %p1723_p9 = scmp.lt.s32.totalorder %s1987_s15, 2  ;;  %s416_s11 = sand.u32 1, %s1987_s15  }
  0x55   : > { %s1994_s28 = smov [#allocation9]   ;;  %p2397_p8 = scmp.eq.s32.totalorder %s1987_s15, 0 }
  0x56   : > { %s431_s29 = sshll.u32 %s1994_s28, 4  ;;  %s417_s12 = scalar_lea.sflag [#allocation5], %s416_s11  ;;  %s432_s29 = int_to_ptr.vmem [resolvable:$true] %s431_s29 }
  0x57   : > { %p2184_p10 = pnand %p1723_p9, %p2397_p8  ;;  %s1891_s21 = scalar_lea.hbm %s2384_s5, 16 }
  0x58   : > { %p1892_p6 = scmp.ne.s32.totalorder %s2384_s5, %s1891_s21  ;;  %p1898_p11 = scmp.lt.u32.totalorder %s1891_s21, %s2384_s5 }
  0x59   : > { %p1893_p7 = pneg %p2184_p10 }
  0x5b   : > { %p1894_p1 = pnand %p1893_p7, %p1892_p6 }
  0x5d   : > { %p1895_p4 = pneg %p1894_p1 }
  0x5f   : > { %p1900_p12 = pnand %p1898_p11, %p1895_p4 }
  0x61   : > { %1903 = shalt.err (!%p1900_p12)
}
  0x62   : > { %s1904_s24 = scalar_lea.vmem %s432_s29, 16  ;;  %s1911_s26 = scalar_lea.vmem %s432_s29, 32 }
  0x63   : > { %p1905_p13 = scmp.ne.s32.totalorder %s432_s29, %s1904_s24  ;;  %p1912_p3 = scmp.lt.s32.totalorder %s432_s29, %s432_s29 }
  0x64   : > { %p1913_p5 = scmp.lt.s32.totalorder %s1911_s26, %s1904_s24 }
  0x65   : > { %p1907_p0 = pnand %p1905_p13, %p1893_p7 }
  0x66   : > { %p1914_p9 = por %p1913_p5, %p1912_p3 }
  0x67   : > { %p1908_p2 = pneg %p1907_p0 }
  0x69   : > { %p1915_p8 = pnand %p1914_p9, %p1908_p2 }
  0x6b   : > { %1918 = shalt.err (!%p1915_p8)
}
  0x6c   : > { %1719 = dma.hbm_to_vmem [thread:$0]  (!%p2184_p10), %s2384_s5, 16, %s432_s29, %s417_s12  }
  0x6d   : > { %p2399_p6 = scmp.ne.s32.totalorder %s2393_s18, 0 }
  0x6e   : > { %p2400_p1 = scmp.eq.s32.totalorder (!%p2399_p6), %s2089_s16, 0 }
  0x6f   : > { %474 = sbr.rel (%p2399_p6) target bundleno = 2354 (0x932), region = 60 }
  0x76   : > { %1958 = dma.done.wait (%p2400_p1), [#allocation5], 128   ;;  %p2401_p7 = pmov %p2400_p1 }
  0x77   : > { %p2402_p4 = pmov %p2400_p1 }
  0x78   : > { %1960 = vsyncadd (%p2401_p7), [#allocation5], 4294967168 }
  0x79   : > { %1962 = dma.done.wait (%p2402_p4), [#allocation8], 64   ;;  %p2403_p11 = pmov %p2400_p1 }
  0x7a   : > { %s484_s11 = sand.u32 1, %s2089_s16   ;;  %p2404_p10 = pmov %p2400_p1 }
  0x7b   : > { %1964 = vsyncadd (%p2403_p11), [#allocation8], 4294967232  ;;  %s485_s28 = scalar_lea.sflag [#allocation5], %s484_s11 }
  0x7c   : > { %1966 = dma.done.wait (%p2404_p10), %s485_s28, 16   ;;  %p2405_p12 = pmov %p2400_p1 }
  0x7d   : > { %p2406_p13 = pmov %p2400_p1 }
  0x7e   : > { %1968 = vsyncadd (%p2405_p12), %s485_s28, 4294967280 }
  0x7f   : > { %1970 = dma.done.wait (%p2406_p13), [#allocation8], 256   ;;  %p2407_p0 = pmov %p2400_p1 }
  0x80   : > { %p1566_p2 = scmp.ne.s32.totalorder %s1979_s13, 0 }
  0x81   : > { %1972 = vsyncadd (%p2407_p0), [#allocation8], 4294967040  ;;  %v608_v0 = vld [vmem:[%s2381_s2] sm:$0xf] (!%p1566_p2)  ;;  %vm620_vm0 = vcmask (!%p1566_p2), 1043456   ;;  %v1995_v2 = vmov (!%p1566_p2), 0.0  }
  0x82   : > { %605 = sbr.rel (%p1566_p2) target bundleno = 351 (0x15f), region = 84  ;;  %v606_v1 = vld [vmem:[#allocation4] sm:$0xff] (!%p1566_p2)  ;;  %1618 = vmatprep.subr.bf16.mxu0 (!%p1566_p2), %v1995_v2  ;;  %v622_v3 = vsel (!%p1566_p2), %vm620_vm0, %v608_v0, 0  ;;  %vm1996_vm1 = vmmov (!%p1566_p2), 0   ;;  %vm616_vm2 = vcmask (!%p1566_p2), 64512  }
  0x83   : > { %1620 = vmatprep.mubr.msk.bf16.mxu0 (!%p1566_p2), %vm1996_vm1, %v1995_v2  ;;  %v607_v4 = vpack.c.bf16 (!%p1566_p2), %v606_v1, %v606_v1  ;;  %1619 = vmatpush3.bf16.msra.mxu0 (!%p1566_p2), %v622_v3  ;;  %v1567_v5 = vld [vmem:[%s2382_s3] ss:$0 sm:$0xff] (!%p1566_p2) }
  0x86   : > { %1621 = vmatmul.mubr.msk.bf16.vlgmr.msra.gmra.mrb[0].mxu0 (!%p1566_p2), %vm616_vm2, %v607_v4 }
 0x159   : > { %v658_v6 = vpop.f32.mrb[0].mxu0 }
 0x15a   : > { %v659_v7 = vadd.f32 %v1567_v5, %v658_v6  ;;  %v1622_v8 = vpop.f32.mrb[1].mxu0 }
 0x15b   : > { %v661_v9 = vpop.f32.mrb[2].mxu0 }
 0x15c   : > { %v664_v10 = vpack.c.bf16 %v659_v7, %v659_v7  ;;  %v1623_v11 = vpop.f32.mrb[3].mxu0 }
 0x15e   : > { %665 = vst [vmem:[#allocation2] sm:$0xf] %v664_v10 }
 0x15f PF: > { %p1569_p3 = scmp.lt.s32.totalorder %s1979_s13, 1 }
 0x160   : > { %v670_v12 = vld [vmem:[#allocation3] sm:$0xff] (!%p1569_p3)  ;;  %vm671_vm3 = vcmask (!%p1569_p3), 261120   ;;  %v1782_v19 = vld [vmem:[%s2385_s6] sm:$0xff] (!%p1569_p3)   ;;  %v1997_v20 = vmov (!%p1569_p3), 0.0   ;;  %v1783_v21 = vld [vmem:[%s2385_s6 + $0x8] sm:$0xff] (!%p1569_p3)   ;;  %vm1998_vm4 = vmmov (!%p1569_p3), 0  }
 0x161   : > { %669 = sbr.rel (%p1569_p3) target bundleno = 885 (0x375), region = 88  ;;  %v672_v13 = vsel (!%p1569_p3), %vm671_vm3, %v670_v12, 0.0  ;;  %1624 = vmatprep.subr.bf16.mxu0 (!%p1569_p3), %v1997_v20  ;;  %1628 = vmatprep.mubr.msk.bf16.mxu0 (!%p1569_p3), %vm1998_vm4, %v1997_v20  ;;  %v1570_v26 = vld [vmem:[%s2383_s4] ss:$0 sm:$0xff] (!%p1569_p3)  ;;  %v1571_v28 = vld [vmem:[#allocation9] ss:$0 sm:$0xff] (!%p1569_p3) }
 0x162   : > { %673 = vadd.xlane.f32.xlu0 (!%p1569_p3), %v672_v13  ;;  %1625 = vmatpush3.bf16.msra.mxu0 (!%p1569_p3), %v1782_v19  ;;  %v1572_v32 = vld [vmem:[%s2386_s7] ss:$0 sm:$0xff] (!%p1569_p3) }
 0x163   : > { %1626 = vmatprep.subr.bf16.mxu0 (!%p1569_p3), %v1997_v20 }
 0x166   : > { %1627 = vmatpush3.bf16.msra.mxu0 (!%p1569_p3), %v1783_v21 }
 0x1ef   : > { %v674_v14 = vpop.xlane.xlu0 %673 }
 0x1f0   : > { %v676_v15 = vmul.f32 0.03125, %v674_v14 }
 0x1f2   : > { %v677_v16 = vsub.f32 %v670_v12, %v676_v15 }
 0x1f4   : > { %v678_v17 = vmul.f32 %v677_v16, %v677_v16 }
 0x1f6   : > { %v679_v18 = vsel %vm671_vm3, %v678_v17, 0.0 }
 0x1f7   : > { %680 = vadd.xlane.f32.xlu0 %v679_v18 }
 0x284   : > { %v681_v22 = vpop.xlane.xlu0 %680 }
 0x285   : > { %v682_v23 = vmul.f32 0.03125, %v681_v22 }
 0x287   : > { %v683_v24 = vadd.f32 1e-05, %v682_v23 }
 0x289   : > { %1784 = vrsqrt.f32 %v683_v24 }
 0x293   : > { %v1785_v25 = vpop.eup %1784 }
 0x294   : > { %v685_v27 = vmul.f32 %v1785_v25, %v677_v16 }
 0x296   : > { %v693_v29 = vmul.f32 %v1570_v26, %v685_v27 }
 0x298   : > { %v701_v30 = vadd.f32 %v1571_v28, %v693_v29 }
 0x29a   : > { %v702_v31 = vpack.c.bf16 %v701_v30, %v701_v30 }
 0x29c   : > { %1629 = vmatmul.mubr.msk.bf16.vlgmr.msra.gmra.mrb[0].mxu0 %vm671_vm3, %v702_v31 }
 0x36f   : > { %v763_v33 = vpop.f32.mrb[0].mxu0 }
 0x370   : > { %v764_v34 = vadd.f32 %v1572_v32, %v763_v33  ;;  %v1630_v35 = vpop.f32.mrb[1].mxu0 }
 0x371   : > { %v766_v36 = vpop.f32.mrb[2].mxu0 }
 0x372   : > { %v769_v37 = vpack.c.bf16 %v764_v34, %v764_v34  ;;  %v1631_v38 = vpop.f32.mrb[3].mxu0 }
 0x374   : > { %770 = vst [vmem:[#allocation2] sm:$0xf] %v769_v37 }
 0x375 PF: > { %v1999_v40 = vmov 0.0   ;;  %s2000_s0 = smov 96   ;;  %vm2001_vm5 = vmmov 0   ;;  %vm793_vm6 = vcmask 64512   ;;  %v2002_v44 = vmov 0   ;;  %s2003_s27 = smov 64  }
 0x376   : > { %1632 = vmatprep.subr.bf16.mxu0 %v1999_v40  ;;  %1638 = vmatprep.subr.bf16.mxu1 %v1999_v40  ;;  %s2004_s11 = smov 88   ;;  %s2005_s28 = smov 120   ;;  %v2270_v46 = vld [vmem:[#allocation7] sm:$0xf]  ;;  %vm859_vm9 = vcmask 1043456   ;;  %vm774_vm10 = vcmask 60416  }
 0x377   : > { %1634 = vmatprep.mubr.msk.bf16.mxu0 %vm2001_vm5, %v1999_v40  ;;  %1640 = vmatprep.mubr.msk.bf16.mxu1 %vm2001_vm5, %v1999_v40  ;;  %s2006_s18 = smov 80   ;;  %s2007_s29 = smov 112   ;;  %vm773_vm7 = vcmp.gt.bf16.partialorder %v2270_v46, 0  ;;  %v777_v32 = vsel %vm774_vm10, %v2270_v46, 4286644096  ;;  %vm1254_vm13 = vcmask 130048  }
 0x378   : > { %1786 = vset.pattern.permute.xlu0 %v2002_v44  ;;  %s2008_s30 = smov 72   ;;  %s2009_s12 = smov 104   ;;  %v840_v47 = vsel %vm773_vm7, 65537, %v2002_v44  ;;  %vm1256_vm14 = vcmask 195584   ;;  %vm1280_vm1 = vcmask 261120  }
 0x379   : > { %v841_v48 = vunpack.c.l.b16 %v840_v47  ;;  %s2010_s19 = smov 56   ;;  %s2011_s22 = smov 48  }
 0x37a   : > { %s2012_s21 = smov 40   ;;  %s2013_s23 = smov 8  }
 0x37b   : > { %v2246_v39 = vld [vmem:[#allocation2] ss:$0 sps:$4 sm:$0xff]   ;;  %vm2274_vm8 = vcmp.ne.s32.totalorder %v841_v48, 0  ;;  %s2014_s25 = smov 16   ;;  %s2015_s20 = smov 24  }
 0x37c   : > { %791 = vrot.lane.b32.xlu0 %v2246_v39, %s2000_s0  ;;  %v2257_v43 = vld [vmem:[#allocation2] sm:$0xf]  ;;  %854 = vrot.lane.b32.xlu1 %v2246_v39, %s2003_s27  ;;  %s2016_s24 = smov 32   ;;  %p1273_p5 = scmp.ge.s32.totalorder %s1979_s13, 1 }
 0x37d   : > { %v1579_v45 = vcombine.low %v2257_v43, %v2257_v43  ;;  %s2017_s27 = smov [#allocation11]   ;;  %p1727_p9 = scmp.eq.s32.totalorder %s2089_s16, 1 }
 0x37e   : > { %s1275_s26 = scalar_select %p1273_p5, 1, 0 }
 0x380   : > { %910 = vrot.lane.b32.xlu1 %v2246_v39, %s2004_s11  ;;  %s1359_s11 = sshll.u32 %s2017_s27, 4  ;;  %s1360_s11 = int_to_ptr.vmem [resolvable:$true] %s1359_s11 }
 0x381   : > { %p1926_p7 = scmp.lt.s32.totalorder %s1360_s11, %s1360_s11 }
 0x384   : > { %908 = vrot.lane.b32.xlu1 %v1579_v45, %s2005_s28  ;;  %s1919_s28 = scalar_lea.vmem %s1360_s11, 128 }
 0x385   : > { %p1920_p8 = scmp.ne.s32.totalorder %s1360_s11, %s1919_s28  ;;  %p1927_p4 = scmp.lt.s32.totalorder %s1919_s28, %s1919_s28 }
 0x387   : > { %p1921_p6 = pnand %p1920_p8, %p1727_p9  ;;  %p1928_p11 = por %p1927_p4, %p1926_p7 }
 0x388   : > { %1021 = vrot.lane.b32.xlu1 %v2246_v39, %s2006_s18 }
 0x389   : > { %p1922_p1 = pneg %p1921_p6 }
 0x38b   : > { %p1929_p10 = pnand %p1928_p11, %p1922_p1 }
 0x38c   : > { %1019 = vrot.lane.b32.xlu1 %v1579_v45, %s2007_s29 }
 0x390   : > { %1132 = vrot.lane.b32.xlu1 %v2246_v39, %s2008_s30 }
 0x394   : > { %1130 = vrot.lane.b32.xlu1 %v1579_v45, %s2009_s12 }
 0x3ee   : > { %v792_v41 = vpop.permute.xlu0 %791  ;;  %v855_v56 = vpop.permute.xlu1 %854 }
 0x3ef   : > { %v798_v42 = vsel %vm793_vm6, %v792_v41, 0  ;;  %v861_v57 = vsel %vm859_vm9, %v855_v56, 0 }
 0x3f0   : > { %1633 = vmatpush3.bf16.xpose.msra.mxu0 %v798_v42  ;;  %1639 = vmatpush3.bf16.msra.mxu1 %v861_v57 }
 0x3f1   : > { %1650 = vmatprep.subr.bf16.mxu0 %v1999_v40  ;;  %1644 = vmatprep.subr.bf16.mxu1 %v1999_v40 }
 0x3f2   : > { %v911_v61 = vpop.permute.xlu1 %910 }
 0x3f3   : > { %v916_v0 = vsel %vm793_vm6, %v911_v61, 0 }
 0x3f6   : > { %v909_v62 = vpop.permute.xlu1 %908 }
 0x3f7   : > { %1635 = vmatmul.mubr.msk.bf16.vlgmr.msra.gmra.mrb[0].mxu0 %vm793_vm6, %v2257_v43 }
 0x3f8   : > { %1652 = vmatprep.mubr.msk.bf16.mxu0 %vm2001_vm5, %v1999_v40 }
 0x3fa   : > { %v1022_v2 = vpop.permute.xlu1 %1021 }
 0x3fb   : > { %v1027_v4 = vsel %vm793_vm6, %v1022_v2, 0 }
 0x3fe   : > { %v1020_v3 = vpop.permute.xlu1 %1019 }
 0x402   : > { %v1133_v5 = vpop.permute.xlu1 %1132 }
 0x403   : > { %v1138_v6 = vsel %vm793_vm6, %v1133_v5, 0 }
 0x406   : > { %v1131_v7 = vpop.permute.xlu1 %1130 }
 0x4ca   : > { %v834_v50 = vpop.f32.mrb[0].mxu0 }
 0x4cb   : > { %v843_v51 = vsel %vm2274_vm8, %v834_v50, -1e+30  ;;  %v1636_v52 = vpop.f32.mrb[1].mxu0 }
 0x4cc   : > { %v837_v53 = vpop.f32.mrb[2].mxu0  ;;  %v844_v54 = vsel %vm793_vm6, %v843_v51, -inf }
 0x4cd   : > { %v1637_v55 = vpop.f32.mrb[3].mxu0  ;;  %845 = vmax.xlane.f32.xlu0 %v844_v54 }
 0x4e3   : > { %969 = vrot.lane.b32.xlu0 %v2246_v39, %s2010_s19 }
 0x55a   : > { %v846_v58 = vpop.xlane.xlu0 %845 }
 0x55b   : > { %v847_v59 = vsub.f32 %v843_v51, %v846_v58 }
 0x55d   : > { %v848_v60 = vmul.f32 1.442695, %v847_v59 }
 0x55e   : > { %v970_v8 = vpop.permute.xlu0 %969 }
 0x55f   : > { %1791 = vpow2.f32 %v848_v60  ;;  %v975_v9 = vsel %vm859_vm9, %v970_v8, 0  ;;  %v1789_v8 = vld [vmem:[#allocation10] sm:$0xff]  }
 0x560   : > { %1651 = vmatpush3.bf16.msra.mxu0 %v975_v9 }
 0x561   : > { %1662 = vmatprep.subr.bf16.mxu0 %v1999_v40 }
 0x569   : > { %v2284_v63 = vpop.eup %1791 }
 0x56a   : > { %v853_v1 = vpack.c.bf16 %v2284_v63, %v2284_v63  ;;  %v850_v58 = vsel %vm793_vm6, %v2284_v63, 0.0 }
 0x56c   : > { %1641 = vmatmul.mubr.msk.bf16.vlgmr.msra.gmra.mrb[0].mxu1 %vm793_vm6, %v853_v1 }
 0x56d   : > { %1645 = vmatpush3.bf16.xpose.msra.mxu1 %v916_v0  ;;  %1646 = vmatprep.mubr.msk.bf16.mxu1 %vm2001_vm5, %v1999_v40 }
 0x56e   : > { %1656 = vmatprep.subr.bf16.mxu1 %v1999_v40 }
 0x574   : > { %1647 = vmatmul.mubr.msk.bf16.vlgmr.msra.gmra.mrb[4].mxu1 %vm793_vm6, %v909_v62 }
 0x575   : > { %1657 = vmatpush3.bf16.xpose.msra.mxu1 %v1027_v4  ;;  %1658 = vmatprep.mubr.msk.bf16.mxu1 %vm2001_vm5, %v1999_v40 }
 0x576   : > { %1668 = vmatprep.subr.bf16.mxu1 %v1999_v40 }
 0x57c   : > { %1659 = vmatmul.mubr.msk.bf16.vlgmr.msra.gmra.mrb[8].mxu1 %vm793_vm6, %v1020_v3 }
 0x57d   : > { %1669 = vmatpush3.bf16.xpose.msra.mxu1 %v1138_v6  ;;  %1670 = vmatprep.mubr.msk.bf16.mxu1 %vm2001_vm5, %v1999_v40 }
 0x57e   : > { %1680 = vmatprep.subr.bf16.mxu1 %v1999_v40 }
 0x584   : > { %1671 = vmatmul.mubr.msk.bf16.vlgmr.msra.gmra.mrb[12].mxu1 %vm793_vm6, %v1131_v7 }
 0x585   : > { %1684 = vmatprep.mubr.msk.bf16.mxu1 %vm2001_vm5, %v1999_v40  ;;  %1681 = vmatpush3.bf16.msra.mxu1 %v1789_v8 }
 0x586   : > { %1682 = vmatprep.subr.bf16.mxu1 %v1999_v40 }
 0x63f   : > { %v2308_v10 = vpop.f32.mrb[0].mxu1 }
 0x640   : > { %v1642_v11 = vpop.f32.mrb[1].mxu1 }
 0x641   : > { %v900_v12 = vpop.f32.mrb[2].mxu1 }
 0x642   : > { %v1643_v13 = vpop.f32.mrb[3].mxu1 }
 0x647   : > { %v952_v14 = vpop.f32.mrb[4].mxu1 }
 0x648   : > { %v958_v15 = vsel %vm2274_vm8, %v952_v14, -1e+30  ;;  %v1648_v16 = vpop.f32.mrb[5].mxu1 }
 0x649   : > { %v955_v17 = vpop.f32.mrb[6].mxu1  ;;  %v959_v18 = vsel %vm793_vm6, %v958_v15, -inf }
 0x64a   : > { %960 = vmax.xlane.f32.xlu1 %v959_v18  ;;  %v1649_v19 = vpop.f32.mrb[7].mxu1 }
 0x64f   : > { %v1063_v20 = vpop.f32.mrb[8].mxu1 }
 0x650   : > { %v1069_v21 = vsel %vm2274_vm8, %v1063_v20, -1e+30  ;;  %v1660_v22 = vpop.f32.mrb[9].mxu1 }
 0x651   : > { %v1066_v23 = vpop.f32.mrb[10].mxu1  ;;  %v1070_v24 = vsel %vm793_vm6, %v1069_v21, -inf  ;;  %v1258_v22 = vunpack.c.l.bf16 %v2257_v43  ;;  %v1276_v43 = vstv %s1275_s26 }
 0x652   : > { %1071 = vmax.xlane.f32.xlu0 %v1070_v24  ;;  %v1661_v25 = vpop.f32.mrb[11].mxu1  ;;  %vm1277_vm0 = vcmp.eq.s32.totalorder %v1276_v43, 1 }
 0x657   : > { %v1174_v26 = vpop.f32.mrb[12].mxu1 }
 0x658   : > { %v1180_v27 = vsel %vm2274_vm8, %v1174_v26, -1e+30  ;;  %v1672_v28 = vpop.f32.mrb[13].mxu1 }
 0x659   : > { %v1177_v29 = vpop.f32.mrb[14].mxu1  ;;  %v1181_v30 = vsel %vm793_vm6, %v1180_v27, -inf }
 0x65a   : > { %1182 = vmax.xlane.f32.xlu0 %v1181_v30  ;;  %v1673_v31 = vpop.f32.mrb[15].mxu1 }
 0x65b   : > { %1080 = vrot.lane.b32.xlu1 %v2246_v39, %s2011_s22 }
 0x670   : > { %1191 = vrot.lane.b32.xlu0 %v2246_v39, %s2012_s21 }
 0x68f   : > { %779 = vmax.xlane.bf16.xlu0 %v777_v32 }
 0x6d7   : > { %v961_v33 = vpop.xlane.xlu1 %960 }
 0x6d8   : > { %v962_v34 = vsub.f32 %v958_v15, %v961_v33  ;;  %v1790_v15 = vld [vmem:[#allocation10 + $0x8] sm:$0xff]  }
 0x6d9   : > { %1683 = vmatpush3.bf16.msra.mxu1 %v1790_v15 }
 0x6da   : > { %v963_v35 = vmul.f32 1.442695, %v962_v34 }
 0x6db   : > { %v1081_v41 = vpop.permute.xlu1 %1080 }
 0x6dc   : > { %1793 = vpow2.f32 %v963_v35  ;;  %v1086_v45 = vsel %vm859_vm9, %v1081_v41, 0 }
 0x6df   : > { %v1072_v36 = vpop.xlane.xlu0 %1071 }
 0x6e0   : > { %v1073_v37 = vsub.f32 %v1069_v21, %v1072_v36 }
 0x6e2   : > { %v1074_v38 = vmul.f32 1.442695, %v1073_v37  ;;  %v1586_v37 = vld [vmem:[%s2388_s9] ss:$0 sm:$0xff] }
 0x6e4   : > { %1795 = vpow2.f32 %v1074_v38 }
 0x6e6   : > { %v1794_v42 = vpop.eup %1793 }
 0x6e7   : > { %v1183_v47 = vpop.xlane.xlu0 %1182  ;;  %v965_v48 = vsel %vm793_vm6, %v1794_v42, 0.0  ;;  %v968_v39 = vpack.c.bf16 %v1794_v42, %v1794_v42 }
 0x6e8   : > { %v1184_v49 = vsub.f32 %v1180_v27, %v1183_v47  ;;  %966 = vadd.xlane.f32.xlu1 %v965_v48 }
 0x6e9   : > { %1653 = vmatmul.mubr.msk.bf16.vlgmr.msra.gmra.mrb[4].mxu0 %vm793_vm6, %v968_v39 }
 0x6ea   : > { %v1185_v46 = vmul.f32 1.442695, %v1184_v49  ;;  %1663 = vmatpush3.bf16.msra.mxu0 %v1086_v45  ;;  %1664 = vmatprep.mubr.msk.bf16.mxu0 %vm2001_vm5, %v1999_v40 }
 0x6eb   : > { %1674 = vmatprep.subr.bf16.mxu0 %v1999_v40  ;;  %v1192_v50 = vpop.permute.xlu0 %1191 }
 0x6ec   : > { %1797 = vpow2.f32 %v1185_v46  ;;  %v1197_v52 = vsel %vm859_vm9, %v1192_v50, 0 }
 0x6ee   : > { %v1796_v51 = vpop.eup %1795 }
 0x6ef   : > { %v1076_v53 = vsel %vm793_vm6, %v1796_v51, 0.0  ;;  %v1079_v54 = vpack.c.bf16 %v1796_v51, %v1796_v51 }
 0x6f0   : > { %1077 = vadd.xlane.f32.xlu0 %v1076_v53 }
 0x6f1   : > { %1665 = vmatmul.mubr.msk.bf16.vlgmr.msra.gmra.mrb[8].mxu0 %vm793_vm6, %v1079_v54 }
 0x6f2   : > { %1675 = vmatpush3.bf16.msra.mxu0 %v1197_v52  ;;  %1676 = vmatprep.mubr.msk.bf16.mxu0 %vm2001_vm5, %v1999_v40 }
 0x6f6   : > { %v1798_v55 = vpop.eup %1797 }
 0x6f7   : > { %v1187_v56 = vsel %vm793_vm6, %v1798_v55, 0.0  ;;  %v1190_v57 = vpack.c.bf16 %v1798_v55, %v1798_v55 }
 0x6f8   : > { %1188 = vadd.xlane.f32.xlu0 %v1187_v56 }
 0x6f9   : > { %1677 = vmatmul.mubr.msk.bf16.vlgmr.msra.gmra.mrb[12].mxu0 %vm793_vm6, %v1190_v57 }
 0x6fc   : > { %851 = vadd.xlane.f32.xlu0 %v850_v58 }
 0x720   : > { %v780_v59 = vpop.xlane.xlu0 %779 }
 0x721   : > { %vm781_vm11 = vcmp.gt.bf16.partialorder %v780_v59, 0 }
 0x722   : > { %v1259_v60 = vsel %vm781_vm11, 65537, %v2002_v44 }
 0x723   : > { %v1260_v61 = vunpack.c.l.b16 %v1259_v60 }
 0x725   : > { %vm1261_vm12 = vcmp.ne.s32.totalorder %v1260_v61, 0 }
 0x726   : > { %v1262_v62 = vsel %vm1261_vm12, 1, %v2002_v44 }
 0x727   : > { %1264 = vperm.xlu0 %1786, %v1262_v62  }
 0x775   : > { %v967_v0 = vpop.xlane.xlu1 %966 }
 0x776   : > { %1799 = vrcp.f32 %v967_v0 }
 0x77d   : > { %v1078_v1 = vpop.xlane.xlu0 %1077 }
 0x77e   : > { %1801 = vrcp.f32 %v1078_v1 }
 0x780   : > { %v1800_v2 = vpop.eup %1799 }
 0x785   : > { %v1189_v63 = vpop.xlane.xlu0 %1188 }
 0x786   : > { %1803 = vrcp.f32 %v1189_v63 }
 0x788   : > { %v1802_v9 = vpop.eup %1801 }
 0x789   : > { %v852_v40 = vpop.xlane.xlu0 %851 }
 0x78a   : > { %1805 = vrcp.f32 %v852_v40 }
 0x790   : > { %v1804_v16 = vpop.eup %1803 }
 0x794   : > { %v1806_v24 = vpop.eup %1805 }
 0x795   : > { %v904_v26 = vmul.f32 %v1806_v24, %v2308_v10 }
 0x7a6   : > { %v1265_v29 = vpop.permute.xlu0 %1264 }
 0x7a7   : > { %vm1266_vm15 = vcmp.eq.s32.totalorder %v1265_v29, 1 }
 0x7bc   : > { %v1011_v3 = vpop.f32.mrb[4].mxu0 }
 0x7bd   : > { %v1018_v4 = vmul.f32 %v1800_v2, %v1011_v3  ;;  %v1654_v5 = vpop.f32.mrb[5].mxu0 }
 0x7be   : > { %v1014_v6 = vpop.f32.mrb[6].mxu0 }
 0x7bf   : > { %1242 = vrot.lane.b32.xlu1 %v1018_v4, %s2013_s23  ;;  %v1655_v7 = vpop.f32.mrb[7].mxu0 }
 0x7c4   : > { %v1122_v11 = vpop.f32.mrb[8].mxu0 }
 0x7c5   : > { %v1129_v44 = vmul.f32 %v1802_v9, %v1122_v11  ;;  %v1666_v12 = vpop.f32.mrb[9].mxu0 }
 0x7c6   : > { %v1125_v13 = vpop.f32.mrb[10].mxu0 }
 0x7c7   : > { %v1667_v14 = vpop.f32.mrb[11].mxu0  ;;  %1246 = vrot.lane.b32.xlu1 %v1129_v44, %s2014_s25 }
 0x7cc   : > { %v1233_v17 = vpop.f32.mrb[12].mxu0 }
 0x7cd   : > { %v1240_v18 = vmul.f32 %v1804_v16, %v1233_v17  ;;  %v1678_v19 = vpop.f32.mrb[13].mxu0 }
 0x7ce   : > { %v1236_v20 = vpop.f32.mrb[14].mxu0 }
 0x7cf   : > { %v1679_v21 = vpop.f32.mrb[15].mxu0  ;;  %1250 = vrot.lane.b32.xlu1 %v1240_v18, %s2015_s20 }
 0x7d3   : > { %1269 = vrot.lane.b32.xlu1 %v1258_v22, %s2016_s24 }
 0x831   : > { %v1243_v23 = vpop.permute.xlu1 %1242 }
 0x832   : > { %v1253_v27 = vsel %vm793_vm6, %v904_v26, %v1243_v23 }
 0x839   : > { %v1247_v25 = vpop.permute.xlu1 %1246 }
 0x83a   : > { %v1255_v28 = vsel %vm1254_vm13, %v1253_v27, %v1247_v25 }
 0x841   : > { %v1251_v30 = vpop.permute.xlu1 %1250 }
 0x842   : > { %v1257_v31 = vsel %vm1256_vm14, %v1255_v28, %v1251_v30 }
 0x843   : > { %v1267_v33 = vsel %vm1266_vm15, %v1257_v31, 0.0 }
 0x845   : > { %v1270_v32 = vpop.permute.xlu1 %1269 }
 0x846   : > { %v1272_v34 = vadd.f32 %v1270_v32, %v1267_v33 }
 0x848   : > { %v1274_v35 = vmax.f32 %v1272_v34, 0.0 }
 0x84a   : > { %v1278_v36 = vsel %vm1277_vm0, %v1274_v35, %v1272_v34 }
 0x84b   : > { %v1282_v10 = vpack.c.bf16 %v1278_v36, %v1278_v36  ;;  %1281 = vst.msk [vmem:[#allocation3] sm:$0xff] %vm1280_vm1, %v1278_v36 }
 0x84d   : > { %1685 = vmatmul.mubr.msk.bf16.vlgmr.msra.gmra.mrb[16].mxu1 %vm1280_vm1, %v1282_v10 }
 0x920   : > { %v1343_v38 = vpop.f32.mrb[16].mxu1 }
 0x921   : > { %v1344_v41 = vadd.f32 %v1586_v37, %v1343_v38  ;;  %v1686_v42 = vpop.f32.mrb[17].mxu1 }
 0x922   : > { %v1346_v45 = vpop.f32.mrb[18].mxu1 }
 0x923   : > { %1349 = vst [vmem:[#allocation11] sm:$0xff] %v1344_v41  ;;  %v1687_v47 = vpop.f32.mrb[19].mxu1 }
 0x924   : > { %1932 = shalt.err (!%p1929_p10)
}
 0x925   : > { %s1933_s30 = scalar_lea.hbm %s2389_s10, 128 }
 0x926   : > { %p1934_p12 = scmp.ne.s32.totalorder %s2389_s10, %s1933_s30  ;;  %p1939_p2 = scmp.lt.u32.totalorder %s1933_s30, %s2389_s10 }
 0x928   : > { %p1935_p13 = pnand %p1934_p12, %p1727_p9 }
 0x92a   : > { %p1936_p0 = pneg %p1935_p13 }
 0x92c   : > { %p1941_p3 = pnand %p1939_p2, %p1936_p0 }
 0x92e   : > { %1944 = shalt.err (!%p1941_p3)
}
 0x92f   : > { %1703 = dma.vmem_to_hbm [thread:$0]  (%p1727_p9), %s1360_s11, 128, %s2389_s10, [#allocation6]  }
 0x930   : > { %1974 = dma.done.wait (%p1727_p9), [#allocation6], 128  }
 0x931   : > { %1976 = vsyncadd (%p1727_p9), [#allocation6], 4294967168 }
 0x932 PF: > { %s23_s15 = sadd.s32 1, %s1987_s15   ;;  %s2410_s13 = smov %s1983_s14 }
 0x933   : > { %p20_p5 = scmp.ge.s32.totalorder %s23_s15, 4   ;;  %s2411_s14 = smov %s2413_s17 }
 0x935   :  { %22 = sbr.rel (!%p20_p5) target bundleno = 6 (0x6), region = 133 }
 0x93c   :  { %1372 = vsyncpa [#allocation5], 1 }
 0x93d   :  { %1374 = vsyncpa [#allocation5 + $0x1], 1 }
 0x93e   :  { %1375 = vsyncpa [#allocation8], 1 }
 0x93f   :  { %1376 = vsyncpa [#allocation6], 1 }
 0x940   :  { %1378 = vsyncpa [#allocation6 + $0x1], 1 }

</bundles_post_ra>
